<compile_context>
chip_gen: v5e
topology: v5e:2x2
jax: 0.10.0
libtpu: 0.0.40
codegen_flags: <defaults>
</compile_context>

<pallas_src>
import jax
import jax.numpy as jnp
from jax.experimental import pallas as pl
from jax.experimental.pallas import tpu as pltpu


def _last_layer_kernel(x_ref, w_ref, b_ref, o_ref):
    # x_ref: (tT, H) current token tile of one batch element
    # w_ref: (H, O)  modulation-folded weights for this batch element
    # b_ref: (1, O)  f32 folded bias (shift @ W + b)
    # o_ref: (tT, O)
    xf = x_ref[...].astype(jnp.float32)                     # LN stats in f32

    # LayerNorm over H, eps=1e-6, no elementwise affine.
    mean = jnp.mean(xf, axis=-1, keepdims=True)             # (tT, 1)
    xc = xf - mean
    var = jnp.mean(xc * xc, axis=-1, keepdims=True)         # biased variance
    xhat = xc * jax.lax.rsqrt(var + 1e-6)                   # (tT, H)

    # Linear with modulation-folded weights; MXU operands in native weight dtype.
    out = jnp.dot(xhat.astype(w_ref.dtype), w_ref[...],
                  preferred_element_type=jnp.float32)        # (tT, O) f32 accum
    out = out + b_ref[...]                                   # broadcast (1, O), f32

    o_ref[...] = out.astype(o_ref.dtype)


def _pick_block_t(T, target):
    """Largest multiple-of-8 divisor of T that is <= target (or T itself)."""
    if T <= target:
        return T
    for cand in range(min(target, T), 7, -1):
        if T % cand == 0 and cand % 8 == 0:
            return cand
    return T


def last_layer_forward(x, shift, scale, w, b, *, block_t=None):
    """x: [B, T, H]; shift/scale: [B, 1, H]; w: [H, O]; b: [O] -> [B, T, O]"""
    B, T, H = x.shape
    O = w.shape[-1]

    # ---- wrapper glue: squeeze(1) + fold adaLN modulation into weights/bias ----
    # ((1+scale)*xhat + shift) @ W + b  ==  xhat @ ((1+scale)[:,None]*W) + (shift@W + b)
    sc = scale.reshape(B, H).astype(jnp.float32)
    sh = shift.reshape(B, H).astype(jnp.float32)
    wf = w.astype(jnp.float32)
    w_fold = ((1.0 + sc)[:, :, None] * wf[None, :, :]).astype(w.dtype)     # [B, H, O]
    b_fold = (sh @ wf + b.astype(jnp.float32)).reshape(B, 1, O)            # [B, 1, O] f32

    # ---- tile the token dimension ----
    if block_t is None:
        # bf16 inputs can take ~2x the rows of f32 for the same HBM/VMEM footprint.
        target = 1024 if jnp.dtype(x.dtype).itemsize <= 2 else 512
        block_t = _pick_block_t(T, target)
    n_t = T // block_t  # block_t divides T by construction

    return pl.pallas_call(
        _last_layer_kernel,
        out_shape=jax.ShapeDtypeStruct((B, T, O), x.dtype),
        grid_spec=pltpu.PrefetchScalarGridSpec(
            num_scalar_prefetch=0,
            grid=(B, n_t),
            in_specs=[
                # x tile: leading batch dim squeezed out of the kernel view
                pl.BlockSpec((pl.Squeezed(), block_t, H), lambda bi, ti: (bi, ti, 0)),
                # per-batch folded weights: constant along the t axis
                pl.BlockSpec((pl.Squeezed(), H, O), lambda bi, ti: (bi, 0, 0)),
                # per-batch folded bias (f32)
                pl.BlockSpec((pl.Squeezed(), 1, O), lambda bi, ti: (bi, 0, 0)),
            ],
            out_specs=pl.BlockSpec((pl.Squeezed(), block_t, O),
                                   lambda bi, ti: (bi, ti, 0)),
        ),
        compiler_params=pltpu.CompilerParams(
            # No cross-step state -> both axes parallel (uses both v7x TensorCores).
            dimension_semantics=("parallel", "parallel"),
            vmem_limit_bytes=32 * 1024 * 1024,
        ),
    )(x, w_fold, b_fold)


def _reference(x, shift, scale, w, b):
    """Pure-JAX reference mirroring the torch forward."""
    B, T, H = x.shape
    sh = shift.reshape(B, H)
    sc = scale.reshape(B, H)
    xf = x.astype(jnp.float32)
    mean = jnp.mean(xf, axis=-1, keepdims=True)
    var = jnp.mean((xf - mean) ** 2, axis=-1, keepdims=True)
    xhat = (xf - mean) / jnp.sqrt(var + 1e-6)
    y = (1.0 + sc[:, None, :]) * xhat + sh[:, None, :]
    return (y @ w.astype(jnp.float32) + b.astype(jnp.float32)).astype(x.dtype)


if __name__ == "__main__":
    # Small shapes implied by the module: hidden_size=H, patch_size=2, out_channels=4
    B, T = 2, 16
    H = 128                       # hidden_size
    patch_size, out_channels = 2, 4
    O = patch_size * patch_size * out_channels   # 16

    key = jax.random.PRNGKey(0)
    kx, ks1, ks2, kw, kb = jax.random.split(key, 5)

    x = jax.random.normal(kx, (B, T, H), dtype=jnp.float32)
    shift = jax.random.normal(ks1, (B, 1, H), dtype=jnp.float32)   # mod[0]
    scale = jax.random.normal(ks2, (B, 1, H), dtype=jnp.float32)   # mod[1]

    # Deterministic parameter init for nn.Linear(H, O): weight stored as [H, O].
    w = (jax.random.normal(kw, (H, O), dtype=jnp.float32) / jnp.sqrt(H)).astype(jnp.float32)
    b = (jax.random.normal(kb, (O,), dtype=jnp.float32) * 0.01).astype(jnp.float32)

    # Use block_t=8 to exercise the T-tiled (multi-step) path at small shapes.
    out = last_layer_forward(x, shift, scale, w, b, block_t=8)
    out = jax.block_until_ready(out)

    ref = _reference(x, shift, scale, w, b)
    assert out.shape == (B, T, O), out.shape
    assert jnp.allclose(out, ref, atol=1e-4, rtol=1e-4), float(jnp.max(jnp.abs(out - ref)))

    # NOTE: adaLN_modulation (SiLU + Linear) is defined in __init__ but never
    # used in the module's forward(), so it is intentionally not implemented.
    print("KERNEL_OK")
</pallas_src>

<mosaic_0001>
module attributes {stable_mosaic.version = 11 : i64} {
  func.func @_last_layer_kernel(%arg0: i32, %arg1: i32, %arg2: memref<1x8x128xf32, #tpu.memory_space<vmem>>, %arg3: memref<1x128x16xf32, #tpu.memory_space<vmem>>, %arg4: memref<1x1x16xf32, #tpu.memory_space<vmem>>, %arg5: memref<1x8x16xf32, #tpu.memory_space<vmem>>) attributes {dimension_semantics = [#tpu.dimension_semantics<parallel>, #tpu.dimension_semantics<parallel>], iteration_bounds = array<i64: 2, 2>, scalar_prefetch = 0 : i64, scratch_operands = 0 : i64, tpu.core_type = #tpu.core_type<tc>, window_params = [{transform_indices = @transform_0, window_bounds = array<i64: 1, 8, 128>}, {transform_indices = @transform_1, window_bounds = array<i64: 1, 128, 16>}, {transform_indices = @transform_2, window_bounds = array<i64: 1, 1, 16>}, {transform_indices = @transform_3, window_bounds = array<i64: 1, 8, 16>}]} {
    %c0 = arith.constant 0 : index
    %c0_0 = arith.constant 0 : index
    %c0_1 = arith.constant 0 : index
    %0 = vector.load %arg2[%c0, %c0_0, %c0_1] : memref<1x8x128xf32, #tpu.memory_space<vmem>>, vector<1x8x128xf32>
    %1 = vector.shape_cast %0 : vector<1x8x128xf32> to vector<8x128xf32>
    %cst = arith.constant dense<0.000000e+00> : vector<8xf32>
    %2 = vector.multi_reduction <add>, %1, %cst [1] : vector<8x128xf32> to vector<8xf32>
    %3 = vector.shape_cast %2 : vector<8xf32> to vector<8x1xf32>
    %cst_2 = arith.constant 1.280000e+02 : f32
    %4 = vector.broadcast %cst_2 : f32 to vector<8x1xf32>
    %5 = arith.divf %3, %4 : vector<8x1xf32>
    %6 = vector.broadcast %5 : vector<8x1xf32> to vector<8x128xf32>
    %7 = arith.subf %1, %6 : vector<8x128xf32>
    %8 = arith.mulf %7, %7 : vector<8x128xf32>
    %cst_3 = arith.constant dense<0.000000e+00> : vector<8xf32>
    %9 = vector.multi_reduction <add>, %8, %cst_3 [1] : vector<8x128xf32> to vector<8xf32>
    %10 = vector.shape_cast %9 : vector<8xf32> to vector<8x1xf32>
    %cst_4 = arith.constant 1.280000e+02 : f32
    %11 = vector.broadcast %cst_4 : f32 to vector<8x1xf32>
    %12 = arith.divf %10, %11 : vector<8x1xf32>
    %cst_5 = arith.constant 9.99999997E-7 : f32
    %13 = vector.broadcast %cst_5 : f32 to vector<8x1xf32>
    %14 = arith.addf %12, %13 : vector<8x1xf32>
    %15 = math.rsqrt %14 : vector<8x1xf32>
    %16 = vector.broadcast %15 : vector<8x1xf32> to vector<8x128xf32>
    %17 = arith.mulf %7, %16 : vector<8x128xf32>
    %c0_6 = arith.constant 0 : index
    %c0_7 = arith.constant 0 : index
    %c0_8 = arith.constant 0 : index
    %18 = vector.load %arg3[%c0_6, %c0_7, %c0_8] : memref<1x128x16xf32, #tpu.memory_space<vmem>>, vector<1x128x16xf32>
    %19 = vector.shape_cast %18 : vector<1x128x16xf32> to vector<128x16xf32>
    %cst_9 = arith.constant dense<0.000000e+00> : vector<8x16xf32>
    %20 = tpu.matmul %17, %19, %cst_9 {dimension_numbers = #tpu.dot_dimension_numbers<[1], [0], [0], [1], [0, 0, 1, 1], [], []>} : vector<8x128xf32>, vector<128x16xf32>, vector<8x16xf32> -> vector<8x16xf32>
    %c0_10 = arith.constant 0 : index
    %c0_11 = arith.constant 0 : index
    %c0_12 = arith.constant 0 : index
    %21 = vector.load %arg4[%c0_10, %c0_11, %c0_12] : memref<1x1x16xf32, #tpu.memory_space<vmem>>, vector<1x1x16xf32>
    %22 = vector.shape_cast %21 : vector<1x1x16xf32> to vector<1x16xf32>
    %23 = vector.broadcast %22 : vector<1x16xf32> to vector<8x16xf32>
    %24 = arith.addf %20, %23 : vector<8x16xf32>
    %c0_13 = arith.constant 0 : index
    %c0_14 = arith.constant 0 : index
    %c0_15 = arith.constant 0 : index
    %25 = vector.load %arg5[%c0_13, %c0_14, %c0_15] : memref<1x8x16xf32, #tpu.memory_space<vmem>>, vector<1x8x16xf32>
    %26 = vector.shape_cast %25 : vector<1x8x16xf32> to vector<8x16xf32>
    %27 = vector.shape_cast %24 : vector<8x16xf32> to vector<1x8x16xf32>
    tpu.vector_store %arg5[%c0_13, %c0_14, %c0_15], %27 {strides = array<i32>} : memref<1x8x16xf32, #tpu.memory_space<vmem>>, vector<1x8x16xf32>,
    return
  }
  func.func @transform_0(%arg0: i32, %arg1: i32) -> (i32, i32, i32) {
    %c0_i32 = arith.constant 0 : i32
    %c0_i32_0 = arith.constant 0 : i32
    return %arg0, %arg1, %c0_i32 : i32, i32, i32
  }
  func.func @transform_1(%arg0: i32, %arg1: i32) -> (i32, i32, i32) {
    %c0_i32 = arith.constant 0 : i32
    %c0_i32_0 = arith.constant 0 : i32
    %c0_i32_1 = arith.constant 0 : i32
    return %arg0, %c0_i32, %c0_i32_0 : i32, i32, i32
  }
  func.func @transform_2(%arg0: i32, %arg1: i32) -> (i32, i32, i32) {
    %c0_i32 = arith.constant 0 : i32
    %c0_i32_0 = arith.constant 0 : i32
    %c0_i32_1 = arith.constant 0 : i32
    return %arg0, %c0_i32, %c0_i32_0 : i32, i32, i32
  }
  func.func @transform_3(%arg0: i32, %arg1: i32) -> (i32, i32, i32) {
    %c0_i32 = arith.constant 0 : i32
    %c0_i32_0 = arith.constant 0 : i32
    return %arg0, %arg1, %c0_i32 : i32, i32, i32
  }
}

</mosaic_0001>

<bundles_post_ra>
// kernel: tpu_custom_call.1
= control target key start
LH: loop header
LB: loop body
LE: loop exit
PB: predicated region body
PF: predicated region fallthrough
CT: control target
= control target key end

     0   :  { %s781_s0 = inlined_call_operand.vmem [shape: f32[2,16,128], index: 0, kind: input, shape index: {}]   ;;  %s782_s1 = inlined_call_operand.vmem [shape: f32[2,128,16], index: 1, kind: input, shape index: {}]   ;;  %s783_s2 = inlined_call_operand.vmem [shape: f32[2,1,16], index: 2, kind: input, shape index: {}]   ;;  %s784_s3 = inlined_call_operand.hbm [shape: f32[2,16,16], index: 3, kind: output, shape index: {}]  }
   0x1   :  { %785 = sst [smem:[#allocation5_spill]] %s781_s0 }
   0x2   :  { %8 = vsyncpa [#allocation3], 0 }
   0x3   :  { %10 = vsyncpa [#allocation3 + $0x1], 0  ;;  %s625_s12 = smov 0   ;;  %s627_s13 = smov 0  }
   0x4   :  { %s629_s14 = smov 0   ;;  %s631_s15 = smov 0  }
   0x5   :  { %s633_s16 = smov 0   ;;  %s635_s17 = smov 0  }
   0x6   :  { %s637_s18 = smov 0   ;;  %s639_s19 = smov 0  }
   0x7 LB: > { %s415_s20 = sadd.s32 4294967295, %s602_s19   ;;  %s416_s21 = sadd.s32 4294967294, %s602_s19   ;;  %s602_s19 = sphi %s639_s19, %s16_s19   ;;  %s598_s18 = sphi %s637_s18, %s795_s18   ;;  %s594_s17 = sphi %s635_s17, %s794_s17   ;;  %s590_s16 = sphi %s633_s16, %s793_s16   ;;  %s586_s15 = sphi %s631_s15, %s792_s15   ;;  %s582_s14 = sphi %s629_s14, %s791_s14   ;;  %s578_s13 = sphi %s627_s13, %s790_s13   ;;  %s574_s12 = sphi %s625_s12, %s789_s12  }
   0x8   : > { %s25_s22 = sadd.s32 1, %s594_s17  ;;  %s28_s23 = sadd.s32 1, %s598_s18 }
   0x9   : > { %p26_p0 = scmp.ge.s32.totalorder %s25_s22, 2  ;;  %p127_p1 = scmp.ne.s32.totalorder %s582_s14, %s578_s13 }
   0xa   : > { %p128_p2 = scmp.eq.s32.totalorder %s415_s20, 3  ;;  %p133_p5 = scmp.ne.s32.totalorder %s578_s13, %s574_s12 }
   0xb   : > { %s797_s22 = smov (%p26_p0, %s25_s22), 0  ;;  %s799_s23 = smov (!%p26_p0, %s28_s23), %s598_s18 }
   0xc   : > { %s113_s24 = ssub.s32 %s594_s17, %s797_s22  ;;  %p676_p3 = por %p128_p2, %p127_p1 }
   0xd   : > { %p30_p4 = scmp.ge.s32.totalorder %s799_s23, 2  ;;  %p134_p6 = scmp.eq.s32.totalorder %s416_s21, 3 }
   0xe   : > { %p419_p7 = scmp.ge.s32.totalorder %s602_s19, 1  ;;  %p177_p9 = scmp.lt.s32.totalorder %s602_s19, 5 }
   0xf   : > { %s801_s23 = smov (%p30_p4, %s799_s23), 0  ;;  %p685_p8 = por %p134_p6, %p133_p5 }
  0x10   : > { %s112_s27 = ssub.s32 %s598_s18, %s801_s23  ;;  %s117_s28 = sadd.s32 1, %s582_s14 }
  0x11   : > { %s114_s29 = sor.u32 %s113_s24, %s112_s27  ;;  %p178_p10 = pnand %p419_p7, %p177_p9 }
  0x12   : > { %p115_p11 = scmp.eq.s32.totalorder %s114_s29, 0  ;;  %p212_p12 = scmp.lt.s32.totalorder (!%p178_p10), %s590_s16, 1 }
  0x13   : > { %181 = sbr.rel (%p178_p10) target bundleno = 424 (0x1a8), region = 32  ;;  %p214_p13 = scmp.lt.s32.totalorder (!%p178_p10), %s586_s15, 1 }
  0x14   : > { %s694_s30 = scalar_select %p115_p11, %s582_s14, %s117_s28  }
  0x15   : > { %s788_s0 = sld [smem:[#allocation5_spill]] (!%p178_p10) }
  0x18   : > { %s699_s4 = scalar_select %p212_p12, %s590_s16, 1  ;;  %v604_v1 = vmov 128.0   ;;  %vm296_vm4 = vcmask 130048  }
  0x19   : > { %s215_s5 = scalar_select %p214_p13, %s586_s15, 1  ;;  %504 = vrcp.f32 %v604_v1 }
  0x1a   : > { %s421_s6 = sshll.u32 %s699_s4, 1  ;;  %s430_s20 = sshll.u32 %s699_s4, 7 }
  0x1b   : > { %s217_s7 = sadd.s32 %s421_s6, %s215_s5  ;;  %s710_s27 = scalar_lea.vmem %s782_s1, %s430_s20 }
  0x1c   : > { %s422_s8 = sshll.u32 %s217_s7, 3  ;;  %v271_v2 = vld [vmem:[%s710_s27 + $0x78] sm:$0xff]  ;;  %v270_v3 = vld [vmem:[%s710_s27 + $0x70] sm:$0xff]  ;;  %v269_v4 = vld [vmem:[%s710_s27 + $0x68] sm:$0xff]  ;;  %s227_s5 = scalar_lea.vmem %s783_s2, %s699_s4 }
  0x1d   : > { %s219_s11 = scalar_lea.vmem %s788_s0, %s422_s8  ;;  %276 = vmatpush.msra.mxu0 %v271_v2  ;;  %v268_v6 = vld [vmem:[%s710_s27 + $0x60] sm:$0xff]  ;;  %v267_v16 = vld [vmem:[%s710_s27 + $0x58] sm:$0xff]  ;;  %v266_v17 = vld [vmem:[%s710_s27 + $0x50] sm:$0xff]  ;;  %s426_s6 = sshll.u32 %s590_s16, 1 }
  0x1e   : > { %v228_v0 = vld [vmem:[%s219_s11] sm:$0xff]  ;;  %v265_v18 = vld [vmem:[%s710_s27 + $0x48] sm:$0xff]  ;;  %v263_v20 = vld [vmem:[%s710_s27 + $0x38] sm:$0xff]  ;;  %s209_s7 = sand.u32 1, %s578_s13   ;;  %s309_s8 = sadd.s32 %s586_s15, %s426_s6 }
  0x1f   : > { %229 = vadd.xlane.f32.xlu0 %v228_v0  ;;  %277 = vmatpush.msra.mxu0 %v270_v3  ;;  %v505_v5 = vpop.eup %504  ;;  %v264_v19 = vld [vmem:[%s710_s27 + $0x40] sm:$0xff]  ;;  %v262_v21 = vld [vmem:[%s710_s27 + $0x30] sm:$0xff]  ;;  %v261_v22 = vld [vmem:[%s710_s27 + $0x28] sm:$0xff]  ;;  %s420_s9 = sshll.u32 %s209_s7, 3  ;;  %s427_s10 = sshll.u32 %s309_s8, 3 }
  0x20   : > { %v232_v7 = vmul.f32 128.0, %v505_v5  ;;  %vm236_vm0 = vweird.f32 %v505_v5  ;;  %v260_v23 = vld [vmem:[%s710_s27 + $0x20] sm:$0xff]  ;;  %v259_v24 = vld [vmem:[%s710_s27 + $0x18] sm:$0xff]  ;;  %v258_v25 = vld [vmem:[%s710_s27 + $0x10] sm:$0xff]  ;;  %s311_s21 = scalar_lea.hbm %s784_s3, %s427_s10  ;;  %s211_s28 = scalar_lea.vmem [#allocation2], %s420_s9 }
  0x21   : > { %278 = vmatpush.msra.mxu0 %v269_v4  ;;  %v257_v26 = vld [vmem:[%s710_s27 + $0x8] sm:$0xff]  ;;  %v256_v27 = vld [vmem:[%s710_s27] sm:$0xff]  ;;  %s313_s29 = sshll.u32 %s211_s28, 4  ;;  %s315_s0 = sshll.u32 %s311_s21, 4  ;;  %s314_s29 = int_to_ptr.vmem [resolvable:$true] %s313_s29  ;;  %s316_s0 = int_to_ptr.hbm [resolvable:$true] %s315_s0 }
  0x22   : > { %v233_v8 = vsub.f32 1.0, %v232_v7  ;;  %v503_v39 = vld [vmem:[%s227_s5] ss:$0 sm:$0xff]  ;;  %s299_s15 = scalar_lea.sflag [#allocation3], %s209_s7  ;;  %s522_s16 = sshra.s32 %s316_s0, 4  ;;  %s523_s16 = int_to_ptr.hbm [resolvable:$true] %s522_s16 }
  0x23   : > { %279 = vmatpush.msra.mxu0 %v268_v6  ;;  %s524_s6 = scalar_lea.hbm %s523_s16, 8  ;;  %s528_s5 = scalar_lea.hbm %s784_s3, 32 }
  0x24   : > { %v234_v9 = vmul.f32 %v505_v5, %v233_v8  ;;  %p525_p0 = scmp.ne.s32.totalorder %s523_s16, %s524_s6  ;;  %p529_p4 = scmp.lt.s32.totalorder %s523_s16, %s784_s3 }
  0x25   : > { %280 = vmatpush.msra.mxu0 %v267_v16  ;;  %p530_p5 = scmp.lt.s32.totalorder %s528_s5, %s524_s6 }
  0x26   : > { %v235_v10 = vadd.f32 %v505_v5, %v234_v9  ;;  %p526_p1 = pnand %p525_p0, %p676_p3 }
  0x27   : > { %281 = vmatpush.msra.mxu0 %v266_v17  ;;  %p531_p6 = por %p530_p5, %p529_p4 }
  0x28   : > { %v237_v11 = vsel %vm236_vm0, %v505_v5, %v235_v10  ;;  %p527_p2 = pneg %p526_p1 }
  0x29   : > { %282 = vmatpush.msra.mxu0 %v265_v18 }
  0x2a   : > { %p532_p7 = pnand %p531_p6, %p527_p2 }
  0x2b   : > { %283 = vmatpush.msra.mxu0 %v264_v19 }
  0x2d   : > { %284 = vmatpush.msra.mxu0 %v263_v20 }
  0x2f   : > { %285 = vmatpush.msra.mxu0 %v262_v21 }
  0x31   : > { %286 = vmatpush.msra.mxu0 %v261_v22 }
  0x33   : > { %287 = vmatpush.msra.mxu0 %v260_v23 }
  0x35   : > { %288 = vmatpush.msra.mxu0 %v259_v24 }
  0x37   : > { %289 = vmatpush.msra.mxu0 %v258_v25 }
  0x39   : > { %290 = vmatpush.msra.mxu0 %v257_v26 }
  0x3b   : > { %291 = vmatpush.msra.mxu0 %v256_v27 }
  0x92   : > { %v230_v12 = vpop.xlane.xlu0 %229 }
  0x93   : > { %v238_v13 = vmul.f32 %v237_v11, %v230_v12 }
  0x95   : > { %v239_v14 = vsub.f32 %v228_v0, %v238_v13 }
  0x97   : > { %v240_v15 = vmul.f32 %v239_v14, %v239_v14 }
  0x99   : > { %241 = vadd.xlane.f32.xlu0 %v240_v15 }
 0x10c   : > { %v242_v28 = vpop.xlane.xlu0 %241 }
 0x10d   : > { %v243_v29 = vmul.f32 %v242_v28, %v237_v11 }
 0x10f   : > { %v244_v30 = vadd.f32 1e-06, %v243_v29 }
 0x111   : > { %506 = vrsqrt.f32 %v244_v30  ;;  %vm251_vm2 = vweird.f32 %v244_v30 }
 0x117   : > { %v507_v31 = vpop.eup %506 }
 0x118   : > { %v246_v32 = vmul.f32 %v507_v31, %v244_v30  ;;  %vm252_vm1 = vweird.f32 %v507_v31 }
 0x119   : > { %vm253_vm3 = vmor %vm251_vm2, %vm252_vm1 }
 0x11a   : > { %v247_v33 = vmul.f32 %v507_v31, %v246_v32 }
 0x11c   : > { %v248_v34 = vmul.f32 0.5, %v247_v33 }
 0x11e   : > { %v249_v35 = vsub.f32 1.5, %v248_v34 }
 0x120   : > { %v250_v36 = vmul.f32 %v507_v31, %v249_v35 }
 0x122   : > { %v254_v37 = vsel %vm253_vm3, %v507_v31, %v250_v36 }
 0x123   : > { %v255_v38 = vmul.f32 %v254_v37, %v239_v14 }
 0x125   : > { %292 = vmatmul.f32.vlgmr.msra.gmra.mxu0 %v255_v38 }
 0x1a2   : > { %v293_v40 = vpop.f32.mrf.mxu0 }
 0x1a3   : > { %v294_v41 = vadd.f32 %v503_v39, %v293_v40 }
 0x1a5   : > { %297 = vst.msk [vmem:[%s211_s28] sm:$0xff] %vm296_vm4, %v294_v41 }
 0x1a6   : > { %535 = shalt.err (!%p532_p7)
}
 0x1a7   : > { %431 = dma.vmem_to_hbm [thread:$0]  (%p676_p3), %s314_s29, 128, %s316_s0, %s299_s15  }
 0x1a8 PF: > { %p437_p9 = scmp.ge.s32.totalorder %s602_s19, 2  ;;  %s327_s7 = sand.u32 1, %s574_s12  }
 0x1a9   : > { %s328_s11 = scalar_lea.sflag [#allocation3], %s327_s7 }
 0x1aa   : > { %p434_p10 = pnand %p437_p9, %p685_p8 }
 0x1ac   : > { %p435_p11 = pneg %p434_p10 }
 0x1ae   : > { %569 = dma.done.wait (%p435_p11), %s328_s11, 128  }
 0x1af   : > { %571 = vsyncadd (%p435_p11), %s328_s11, 4294967168  ;;  %s16_s19 = sadd.s32 1, %s602_s19   ;;  %s789_s12 = smov %s578_s13 }
 0x1b0   : > { %p13_p12 = scmp.ge.s32.totalorder %s16_s19, 6   ;;  %s790_s13 = smov %s582_s14 }
 0x1b1   : > { %s791_s14 = smov %s694_s30  ;;  %s792_s15 = smov %s594_s17 }
 0x1b2   : > { %s793_s16 = smov %s598_s18  ;;  %s794_s17 = smov %s797_s22 }
 0x1b3   : > { %s795_s18 = smov %s801_s23  ;;  %15 = sbr.rel (!%p13_p12) target bundleno = 7 (0x7), region = 73 }
 0x1b8   :  { %334 = vsyncpa [#allocation3], 1 }
 0x1b9   :  { %336 = vsyncpa [#allocation3 + $0x1], 1 }

</bundles_post_ra>
